<compile_context>
chip_gen: v7x
topology: tpu7x:2x2x1
jax: 0.10.0
libtpu: 0.0.40
codegen_flags: <defaults>
</compile_context>

<pallas_src>
import math
import numpy as np
import jax
import jax.numpy as jnp
from jax.experimental import pallas as pl
from jax.experimental.pallas import tpu as pltpu


def _periodic_hann(N):
    # Equivalent to scipy.signal.get_window('hanning', N) (periodic hann).
    n = np.arange(N, dtype=np.float64)
    return (0.5 - 0.5 * np.cos(2.0 * np.pi * n / N)).astype(np.float32)


def make_scale_factor(n_fft, out_shape):
    """Reproduces Rescale.__init__ buffer construction exactly (in numpy)."""
    stride = int(n_fft / 2)
    audio_size = out_shape[1]
    N = n_fft
    padding_size = int((math.ceil(audio_size / stride) - 1) * stride + N - audio_size)
    scale_factor = np.zeros([audio_size + padding_size], dtype=np.float32)
    hanning_square = np.square(_periodic_hann(N))
    for i in range(int(audio_size / stride)):
        scale_factor[i * stride:i * stride + N] += hanning_square
    scale_factor = scale_factor[int(padding_size / 2):audio_size + int(padding_size / 2)]
    # buffer shape (1, 1, audio_size), as in the PyTorch module
    return jnp.asarray(scale_factor)[None, None, :]


def _rescale_kernel(x_ref, inv_ref, o_ref):
    # Pure VPU multiply; the exact reciprocal of (scale + 1e-7) is
    # precomputed once in the wrapper (scale is a fixed (1, L) buffer).
    o_ref[...] = x_ref[...] * inv_ref[...]


def _round_up(x, m):
    return ((x + m - 1) // m) * m


def _vmem_capacity_bytes():
    """Physical VMEM per TensorCore; conservative fallback if query fails."""
    try:
        info = pltpu.get_tpu_info()
        cap = getattr(info, "vmem_capacity_bytes", None)
        if cap:
            return int(cap)
    except Exception:
        pass
    return 64 << 20  # v7x-sized conservative default


_LANE_CAP = 8192  # max lane-tile width (multiple of 128)


def _choose_tiles(rows, L, itemsize, vmem_cap):
    # Per-generation block byte target: ~VMEM/16, clamped to [2 MiB, 8 MiB].
    #   128 MiB parts (v5e/v6e) -> 8 MiB blocks; 64 MiB v7x -> 4 MiB blocks.
    target_bytes = max(2 << 20, min(8 << 20, vmem_cap // 16))

    # Lane tile: full (rounded) L up to a cap -> one linear DMA per block row.
    tile_l = min(_round_up(L, 128), _LANE_CAP)

    # Row tile: fill the byte target; multiple of 8 (or the full tiny extent).
    if rows <= 8:
        tile_r = rows
    else:
        tile_r = max(8, (target_bytes // (itemsize * tile_l)) // 8 * 8)
        tile_r = min(tile_r, _round_up(rows, 8))

    # Megacore (v7x has 2 TCs): guarantee >= 2 grid steps on a parallel axis
    # whenever the input is big enough to split.
    if pl.cdiv(L, tile_l) * pl.cdiv(rows, tile_r) < 2:
        if rows > 8:
            tile_r = max(8, _round_up(pl.cdiv(rows, 2), 8))
        elif L > 128:
            tile_l = max(128, _round_up(pl.cdiv(L, 2), 128))
    return tile_r, tile_l


def rescale_forward(x, scale_factor):
    """x: (B, C, L); scale_factor: (1, 1, L). Computes x / (scale_factor + 1e-7)."""
    B, C, L = x.shape
    rows = B * C
    x2d = x.reshape(rows, L)

    # Hoist the divide out of the kernel: one exact (1, L) reciprocal, done once.
    inv2d = (1.0 / (scale_factor.reshape(1, L) + 1e-07)).astype(x.dtype)

    itemsize = jnp.dtype(x.dtype).itemsize
    vmem_cap = _vmem_capacity_bytes()
    tile_r, tile_l = _choose_tiles(rows, L, itemsize, vmem_cap)

    # Ragged last blocks handled by Pallas -> no pad/slice HBM round trips.
    grid = (pl.cdiv(L, tile_l), pl.cdiv(rows, tile_r))

    # Scoped VMEM: double-buffered in + out blocks, double-buffered scale row,
    # plus headroom; clamped safely inside physical VMEM on every generation.
    block_bytes = tile_r * tile_l * itemsize
    vmem_needed = 4 * block_bytes + 4 * tile_l * itemsize + (2 << 20)
    vmem_limit = max(vmem_needed, 32 << 20)
    vmem_limit = min(vmem_limit, vmem_cap - (8 << 20))
    vmem_limit = int(max(vmem_limit, vmem_needed))

    out2d = pl.pallas_call(
        _rescale_kernel,
        out_shape=jax.ShapeDtypeStruct((rows, L), x.dtype),
        grid_spec=pltpu.PrefetchScalarGridSpec(
            num_scalar_prefetch=0,
            grid=grid,
            in_specs=[
                pl.BlockSpec((tile_r, tile_l), lambda j, i: (i, j)),
                pl.BlockSpec((1, tile_l), lambda j, i: (0, j)),
            ],
            out_specs=pl.BlockSpec((tile_r, tile_l), lambda j, i: (i, j)),
        ),
        compiler_params=pltpu.CompilerParams(
            dimension_semantics=("parallel", "parallel"),
            vmem_limit_bytes=vmem_limit,
        ),
    )(x2d, inv2d)

    return out2d.reshape(B, C, L)


if __name__ == "__main__":
    key = jax.random.PRNGKey(0)

    # --- Test 1: forward-consistent shapes (n_fft=64 -> stride=32, L=256). ---
    n_fft = 64
    audio_size = 256
    scale_factor = make_scale_factor(n_fft, (1, audio_size))   # (1, 1, 256)
    k1, k2 = jax.random.split(key)
    x = jax.random.normal(k1, (2, 1, audio_size), dtype=jnp.float32)

    y = jax.block_until_ready(rescale_forward(x, scale_factor))
    y_ref = x / (scale_factor + 1e-07)
    np.testing.assert_allclose(np.asarray(y), np.asarray(y_ref), rtol=1e-5, atol=1e-6)

    # --- Test 2: non-128-multiple L and multi-channel (exercises ragged blocks). ---
    audio_size2 = 300
    scale_factor2 = make_scale_factor(n_fft, (1, audio_size2))  # (1, 1, 300)
    x2 = jax.random.normal(k2, (2, 4, audio_size2), dtype=jnp.float32)

    y2 = jax.block_until_ready(rescale_forward(x2, scale_factor2))
    y2_ref = x2 / (scale_factor2 + 1e-07)
    np.testing.assert_allclose(np.asarray(y2), np.asarray(y2_ref), rtol=1e-5, atol=1e-6)

    print("KERNEL_OK")
</pallas_src>

<mosaic_0001>
module attributes {stable_mosaic.version = 11 : i64} {
  func.func @_rescale_kernel(%arg0: i32, %arg1: i32, %arg2: memref<2x128xf32, #tpu.memory_space<vmem>>, %arg3: memref<1x128xf32, #tpu.memory_space<vmem>>, %arg4: memref<2x128xf32, #tpu.memory_space<vmem>>) attributes {dimension_semantics = [#tpu.dimension_semantics<parallel>, #tpu.dimension_semantics<parallel>], iteration_bounds = array<i64: 2, 1>, scalar_prefetch = 0 : i64, scratch_operands = 0 : i64, tpu.core_type = #tpu.core_type<tc>, window_params = [{transform_indices = @transform_0, window_bounds = array<i64: 2, 128>}, {transform_indices = @transform_1, window_bounds = array<i64: 1, 128>}, {transform_indices = @transform_2, window_bounds = array<i64: 2, 128>}]} {
    %c0 = arith.constant 0 : index
    %c0_0 = arith.constant 0 : index
    %0 = vector.load %arg2[%c0, %c0_0] : memref<2x128xf32, #tpu.memory_space<vmem>>, vector<2x128xf32>
    %c0_1 = arith.constant 0 : index
    %c0_2 = arith.constant 0 : index
    %1 = vector.load %arg3[%c0_1, %c0_2] : memref<1x128xf32, #tpu.memory_space<vmem>>, vector<1x128xf32>
    %2 = vector.broadcast %1 : vector<1x128xf32> to vector<2x128xf32>
    %3 = arith.mulf %0, %2 : vector<2x128xf32>
    %c0_3 = arith.constant 0 : index
    %c0_4 = arith.constant 0 : index
    %4 = vector.load %arg4[%c0_3, %c0_4] : memref<2x128xf32, #tpu.memory_space<vmem>>, vector<2x128xf32>
    tpu.vector_store %arg4[%c0_3, %c0_4], %3 {strides = array<i32>} : memref<2x128xf32, #tpu.memory_space<vmem>>, vector<2x128xf32>,
    return
  }
  func.func @transform_0(%arg0: i32, %arg1: i32) -> (i32, i32) {
    %c0_i32 = arith.constant 0 : i32
    return %arg1, %arg0 : i32, i32
  }
  func.func @transform_1(%arg0: i32, %arg1: i32) -> (i32, i32) {
    %c0_i32 = arith.constant 0 : i32
    %c0_i32_0 = arith.constant 0 : i32
    return %c0_i32, %arg0 : i32, i32
  }
  func.func @transform_2(%arg0: i32, %arg1: i32) -> (i32, i32) {
    %c0_i32 = arith.constant 0 : i32
    return %arg1, %arg0 : i32, i32
  }
}

</mosaic_0001>

<bundles_post_ra>
// kernel: tpu_custom_call.1
= control target key start
LH: loop header
LB: loop body
LE: loop exit
PB: predicated region body
PF: predicated region fallthrough
CT: control target
= control target key end

     0   :  { %7 = vsyncpa [#allocation3], 0  ;;  %s692_s0 = inlined_call_operand.hbm [shape: f32[2,256], index: 0, kind: input, shape index: {}]   ;;  %s693_s1 = inlined_call_operand.vmem [shape: f32[1,256], index: 1, kind: input, shape index: {}]   ;;  %s694_s2 = inlined_call_operand.hbm [shape: f32[2,256], index: 2, kind: output, shape index: {}]  }
   0x1   :  { %9 = vsyncpa [#allocation3 + $0x1], 0 }
   0x2   :  { %10 = vsyncpa [#allocation4], 0 }
   0x3   :  { %12 = vsyncpa [#allocation4 + $0x1], 0  ;;  %s515_s9 = smov 0   ;;  %s517_s10 = smov 0  }
   0x4   :  { %s519_s11 = smov 0   ;;  %s521_s12 = smov 0  }
   0x5   :  { %s523_s13 = smov 0   ;;  %s525_s14 = smov 0  }
   0x6 LB: > { %s308_s15 = sadd.s32 4294967295, %s496_s14   ;;  %s309_s16 = sadd.s32 4294967294, %s496_s14   ;;  %s496_s14 = sphi %s525_s14, %s18_s14   ;;  %s492_s13 = sphi %s523_s13, %s710_s13   ;;  %s488_s12 = sphi %s521_s12, %s709_s12   ;;  %s484_s11 = sphi %s519_s11, %s708_s11   ;;  %s480_s10 = sphi %s517_s10, %s707_s10   ;;  %s476_s9 = sphi %s515_s9, %s706_s9  }
   0x7   : > { %s30_s17 = sadd.s32 1, %s492_s13  ;;  %s39_s18 = sadd.s32 1, %s484_s11 }
   0x8   : > { %p32_p0 = scmp.ge.s32.totalorder %s30_s17, 2  ;;  %p46_p1 = scmp.ne.s32.totalorder %s484_s11, %s480_s10 }
   0x9   : > { %p47_p2 = scmp.eq.s32.totalorder %s496_s14, 0  ;;  %p52_p3 = scmp.ne.s32.totalorder %s480_s10, %s476_s9 }
   0xa   : > { %s712_s17 = smov (%p32_p0, %s30_s17), 0  ;;  %p53_p5 = scmp.eq.s32.totalorder %s308_s15, 0 }
   0xb   : > { %p556_p4 = por %p47_p2, %p46_p1  ;;  %s35_s20 = ssub.s32 %s492_s13, %s712_s17 }
   0xc   : > { %p104_p6 = scmp.eq.s32.totalorder %s308_s15, 1  ;;  %p37_p7 = scmp.eq.s32.totalorder %s35_s20, 0 }
   0xd   : > { %p562_p8 = por %p53_p5, %p52_p3  ;;  %p110_p10 = scmp.eq.s32.totalorder %s309_s16, 1 }
   0xe   : > { %p566_p9 = por %p104_p6, %p46_p1  ;;  %p334_p13 = scmp.lt.s32.totalorder %s496_s14, 2 }
   0xf   : > { %s571_s23 = scalar_select %p37_p7, %s484_s11, %s39_s18  }
  0x10   : > { %s698_s22 = scalar_select %p566_p9, 1, 0 }
  0x11   : > { %p573_p11 = por %p110_p10, %p52_p3  ;;  %s130_s25 = sand.u32 1, %s484_s11  }
  0x12   : > { %s312_s26 = sshll.u32 %s130_s25, 1  ;;  %s313_s27 = sshll.u32 %s492_s13, 5 }
  0x13   : > { %s699_s24 = scalar_select %p573_p11, 1, 0 }
  0x14   : > { %s584_s30 = scalar_lea.hbm %s692_s0, %s313_s27  ;;  %s134_s3 = scalar_lea.vmem [#allocation2], %s312_s26 }
  0x15   : > { %s143_s4 = sshll.u32 %s134_s3, 4  ;;  %p590_p0 = pnand %p334_p13, %p556_p4  ;;  %s586_s4 = int_to_ptr.vmem [resolvable:$true] %s143_s4 }
  0x16   : > { %s131_s6 = scalar_lea.sflag [#allocation3], %s130_s25  ;;  %s384_s7 = scalar_lea.hbm %s584_s30, 32 }
  0x17   : > { %p385_p3 = scmp.ne.s32.totalorder %s584_s30, %s384_s7  ;;  %p386_p5 = pneg %p590_p0 }
  0x18   : > { %s389_s16 = scalar_lea.hbm %s692_s0, 64  ;;  %p390_p4 = scmp.lt.u32.totalorder %s584_s30, %s692_s0 }
  0x19   : > { %p387_p6 = pnand %p386_p5, %p385_p3  ;;  %p391_p10 = scmp.lt.u32.totalorder %s389_s16, %s384_s7 }
  0x1a   : > { %p393_p12 = scmp.lt.u32.totalorder %s384_s7, %s584_s30 }
  0x1b   : > { %p388_p7 = pneg %p387_p6  ;;  %p392_p13 = por %p391_p10, %p390_p4 }
  0x1d   : > { %p394_p1 = por %p393_p12, %p392_p13 }
  0x1f   : > { %p395_p2 = pnand %p394_p1, %p388_p7 }
  0x21   : > { %398 = shalt.err (!%p395_p2)
}
  0x22   : > { %s399_s20 = scalar_lea.vmem %s586_s4, 32  ;;  %s498_s25 = smov [#allocation2]  }
  0x23   : > { %p400_p3 = scmp.ne.s32.totalorder %s586_s4, %s399_s20  ;;  %s404_s26 = sshll.u32 %s498_s25, 4  ;;  %s405_s26 = int_to_ptr.vmem [resolvable:$false] %s404_s26 }
  0x24   : > { %s406_s27 = scalar_lea.vmem %s405_s26, 64  ;;  %p407_p9 = scmp.lt.s32.totalorder %s586_s4, %s405_s26 }
  0x25   : > { %p402_p6 = pnand %p400_p3, %p386_p5  ;;  %p408_p4 = scmp.lt.s32.totalorder %s406_s27, %s399_s20 }
  0x27   : > { %p403_p11 = pneg %p402_p6  ;;  %p409_p10 = por %p408_p4, %p407_p9 }
  0x29   : > { %p410_p12 = pnand %p409_p10, %p403_p11 }
  0x2b   : > { %413 = shalt.err (!%p410_p12)
}
  0x2c   : > { %329 = dma.hbm_to_vmem [thread:$0]  (!%p590_p0), %s584_s30, 32, %s586_s4, %s131_s6  }
  0x2d   : > { %p701_p1 = scmp.lt.s32.totalorder %s496_s14, 3  ;;  %p702_p2 = scmp.ge.s32.totalorder %s496_s14, 1 }
  0x2f   : > { %p155_p5 = pnand %p702_p2, %p701_p1 }
  0x30   : > { %s626_s28 = sand.u32 (!%p155_p5), 1, %s480_s10  }
  0x31   : > { %158 = sbr.rel (%p155_p5) target bundleno = 85 (0x55), region = 28  ;;  %s315_s29 = sshll.u32 (!%p155_p5), %s626_s28, 1 }
  0x32   : > { %s161_s3 = scalar_lea.sflag (!%p155_p5), [#allocation3], %s626_s28  ;;  %s164_s7 = scalar_lea.vmem (!%p155_p5), [#allocation2], %s315_s29 }
  0x38   : > { %467 = dma.done.wait (%p562_p8), %s161_s3, 32  }
  0x39   : > { %469 = vsyncadd (%p562_p8), %s161_s3, 4294967264  ;;  %p188_p9 = scmp.lt.s32.totalorder %s488_s12, 1  ;;  %s187_s8 = scalar_lea.vmem [#allocation5], %s315_s29  ;;  %v191_v0 = vld [vmem:[%s164_s7] sm:$0x3] }
  0x3a   : > { %s217_s15 = sshll.u32 %s187_s8, 4  ;;  %s319_s16 = sshll.u32 %s488_s12, 5  ;;  %s640_s15 = int_to_ptr.vmem [resolvable:$true] %s217_s15 }
  0x3b   : > { %s189_s30 = scalar_select %p188_p9, %s488_s12, 1 }
  0x3c   : > { %s645_s19 = scalar_lea.hbm %s694_s2, %s319_s16  ;;  %s202_s20 = scalar_lea.sflag [#allocation4], %s626_s28 }
  0x3d   : > { %s190_s6 = scalar_lea.vmem %s693_s1, %s189_s30  ;;  %s414_s25 = scalar_lea.vmem %s640_s15, 32 }
  0x3e   : > { %v317_v1 = vld [vmem:[%s190_s6] ss:$0 sm:$0xff]  ;;  %p415_p8 = scmp.ne.s32.totalorder %s640_s15, %s414_s25  ;;  %p703_p11 = scmp.ne.s32.totalorder %s698_s22, 0 }
  0x3f   : > { %v199_v2 = vmul.f32 %v317_v1, %v191_v0  ;;  %s499_s12 = smov [#allocation5]  }
  0x40   : > { %p416_p0 = pnand %p415_p8, %p703_p11  ;;  %s418_s26 = sshll.u32 %s499_s12, 4  ;;  %s419_s26 = int_to_ptr.vmem [resolvable:$false] %s418_s26 }
  0x41   : > { %200 = vst [vmem:[%s187_s8] sm:$0x3] %v199_v2  ;;  %s420_s27 = scalar_lea.vmem %s419_s26, 64  ;;  %p421_p13 = scmp.lt.s32.totalorder %s640_s15, %s419_s26 }
  0x42   : > { %p417_p7 = pneg %p416_p0  ;;  %p422_p3 = scmp.lt.s32.totalorder %s420_s27, %s414_s25 }
  0x44   : > { %p423_p6 = por %p422_p3, %p421_p13 }
  0x46   : > { %p424_p4 = pnand %p423_p6, %p417_p7 }
  0x48   : > { %427 = shalt.err (!%p424_p4)
}
  0x49   : > { %s428_s28 = scalar_lea.hbm %s645_s19, 32  ;;  %s432_s7 = scalar_lea.hbm %s694_s2, 64 }
  0x4a   : > { %p429_p10 = scmp.ne.s32.totalorder %s645_s19, %s428_s28  ;;  %p433_p2 = scmp.lt.u32.totalorder %s645_s19, %s694_s2 }
  0x4b   : > { %p434_p5 = scmp.lt.u32.totalorder %s432_s7, %s428_s28  ;;  %p436_p8 = scmp.lt.u32.totalorder %s428_s28, %s645_s19 }
  0x4c   : > { %p430_p12 = pnand %p429_p10, %p703_p11 }
  0x4d   : > { %p435_p9 = por %p434_p5, %p433_p2 }
  0x4e   : > { %p431_p1 = pneg %p430_p12 }
  0x4f   : > { %p437_p0 = por %p436_p8, %p435_p9 }
  0x51   : > { %p438_p7 = pnand %p437_p0, %p431_p1 }
  0x53   : > { %441 = shalt.err (!%p438_p7)
}
  0x54   : > { %324 = dma.vmem_to_hbm [thread:$0]  (%p703_p11), %s640_s15, 32, %s645_s19, %s202_s20  }
  0x55 PF: > { %s229_s5 = sand.u32 1, %s476_s9   ;;  %p704_p13 = scmp.ne.s32.totalorder %s699_s24, 0 }
  0x56   : > { %p705_p3 = scmp.ge.s32.totalorder %s496_s14, 2  ;;  %s230_s6 = scalar_lea.sflag [#allocation4], %s229_s5 }
  0x58   : > { %p331_p6 = pnand %p705_p3, %p704_p13 }
  0x5a   : > { %471 = dma.done.wait (!%p331_p6), %s230_s6, 32  }
  0x5b   : > { %473 = vsyncadd (!%p331_p6), %s230_s6, 4294967264  ;;  %s18_s14 = sadd.s32 1, %s496_s14   ;;  %s706_s9 = smov %s480_s10 }
  0x5c   : > { %p15_p4 = scmp.ge.s32.totalorder %s18_s14, 4   ;;  %s707_s10 = smov %s484_s11 }
  0x5d   : > { %s708_s11 = smov %s571_s23  ;;  %s709_s12 = smov %s492_s13 }
  0x5e   : > { %s710_s13 = smov %s712_s17  ;;  %17 = sbr.rel (!%p15_p4) target bundleno = 6 (0x6), region = 76 }
  0x65   :  { %235 = vsyncpa [#allocation3], 1 }
  0x66   :  { %237 = vsyncpa [#allocation3 + $0x1], 1 }
  0x67   :  { %238 = vsyncpa [#allocation4], 1 }
  0x68   :  { %240 = vsyncpa [#allocation4 + $0x1], 1 }

</bundles_post_ra>
